<compile_context>
chip_gen: v7x
topology: tpu7x:2x2x1
jax: 0.10.0
libtpu: 0.0.40
codegen_flags: <defaults>
</compile_context>

<pallas_src>
import math
import jax
import jax.numpy as jnp
from jax.experimental import pallas as pl
from jax.experimental.pallas import tpu as pltpu

VMEM_LIMIT = 32 * 1024 * 1024  # safe on v5e/v6e (128 MiB) and v7x (64 MiB physical)


def _round_up(x, m):
    return ((x + m - 1) // m) * m


# ----------------------------------------------------------------------------
# Pallas kernel: tiled matmul + bias (bf16 operands -> f32 accumulate/output)
# used for every conv layer (via im2col) and the hoisted RNN input projection.
# ----------------------------------------------------------------------------
def _mm_bias_kernel(a_ref, w_ref, b_ref, o_ref):
    o_ref[...] = (
        jnp.dot(a_ref[...], w_ref[...], preferred_element_type=jnp.float32)
        + b_ref[...]
    )


def matmul_bias(a, w, b, *, tm=512):
    """a: (M, K) bf16, w: (K, N) bf16 (N % 128 == 0), b: (1, N) f32 -> (M, N) f32."""
    M, K = a.shape
    N = w.shape[1]
    tm_eff = min(tm, _round_up(M, 16))
    Mp = _round_up(M, tm_eff)
    if Mp != M:
        a = jnp.pad(a, ((0, Mp - M), (0, 0)))
    out = pl.pallas_call(
        _mm_bias_kernel,
        out_shape=jax.ShapeDtypeStruct((Mp, N), jnp.float32),
        grid_spec=pltpu.PrefetchScalarGridSpec(
            num_scalar_prefetch=0,
            grid=(Mp // tm_eff,),
            in_specs=[
                pl.BlockSpec((tm_eff, K), lambda i: (i, 0)),   # streamed, double-buffered
                pl.BlockSpec((K, N), lambda i: (0, 0)),        # resident weight block
                pl.BlockSpec((1, N), lambda i: (0, 0)),        # resident bias
            ],
            out_specs=pl.BlockSpec((tm_eff, N), lambda i: (i, 0)),  # lane-dense (N%128==0)
        ),
        compiler_params=pltpu.CompilerParams(
            dimension_semantics=("parallel",),
            vmem_limit_bytes=VMEM_LIMIT,
        ),
    )(a, w, b)
    return out[:M] if Mp != M else out


def conv2d_nhwc(x, wf, bp, stride, kh, kw, cout):
    """PyTorch-semantics Conv2d, channels-last.
    x: (N, H, W, Cin) f32; wf: (kh*kw*Cin, Cout_pad) bf16; bp: (1, Cout_pad) f32."""
    N, H, W, Cin = x.shape
    Ho = (H - kh) // stride + 1
    Wo = (W - kw) // stride + 1
    # TODO(synk): im2col patch extraction is XLA glue; an in-kernel strided-ref gather
    # would cut the extra HBM round-trip of the patch matrix.
    cols = []
    for i in range(kh):
        for j in range(kw):
            cols.append(x[:, i:i + stride * Ho:stride, j:j + stride * Wo:stride, :])
    p = jnp.concatenate(cols, axis=-1)                      # (N, Ho, Wo, kh*kw*Cin)
    p = p.reshape(N * Ho * Wo, kh * kw * Cin).astype(jnp.bfloat16)
    y = matmul_bias(p, wf, bp)                              # (N*Ho*Wo, Cout_pad) f32
    return y[:, :cout].reshape(N, Ho, Wo, cout)


# ----------------------------------------------------------------------------
# Pallas kernel: multi-layer tanh RNN recurrence (nn.RNN, nonlinearity='tanh')
# grid over time; hidden state carried in VMEM scratch; layer-0 input projection
# is precomputed (z0); layers >= 1 use one fused [x, h] @ [W_ih; W_hh] matmul.
# ----------------------------------------------------------------------------
def _rnn_step(nlayers, z0_ref, h0_ref, whh0_ref, wcat_ref, bcat_ref,
              out_ref, hn_ref, h_scr):
    t = pl.program_id(0)

    @pl.when(t == 0)
    def _():
        h_scr[...] = h0_ref[...]

    # layer 0: z0 already contains x @ W_ih0^T + b_ih0 + b_hh0
    h_prev0 = h_scr[0]
    pre0 = z0_ref[0] + jnp.dot(
        h_prev0.astype(jnp.bfloat16), whh0_ref[...],
        preferred_element_type=jnp.float32)
    x = jnp.tanh(pre0)
    h_scr[0] = x

    # layers >= 1: fused single matmul per layer per step
    for l in range(1, nlayers):
        h_prev = h_scr[l]
        xh = jnp.concatenate([x, h_prev], axis=-1).astype(jnp.bfloat16)
        pre = jnp.dot(xh, wcat_ref[l - 1],
                      preferred_element_type=jnp.float32) + bcat_ref[l - 1]
        x = jnp.tanh(pre)          # dropout between layers is identity at inference
        h_scr[l] = x

    out_ref[0] = x                 # lane-dense (H_p % 128 == 0) store

    @pl.when(t == pl.num_programs(0) - 1)
    def _():
        hn_ref[...] = h_scr[...]


def _make_rnn_kernel(nlayers):
    if nlayers >= 2:
        def kernel(z0_ref, h0_ref, whh0_ref, wcat_ref, bcat_ref,
                   out_ref, hn_ref, h_scr):
            _rnn_step(nlayers, z0_ref, h0_ref, whh0_ref, wcat_ref, bcat_ref,
                      out_ref, hn_ref, h_scr)
    else:
        def kernel(z0_ref, h0_ref, whh0_ref, out_ref, hn_ref, h_scr):
            _rnn_step(nlayers, z0_ref, h0_ref, whh0_ref, None, None,
                      out_ref, hn_ref, h_scr)
    return kernel


def rnn_forward(z0, h0, whh0, wcat=None, bcat=None):
    """z0: (seq, B_p, H_p) f32 precomputed layer-0 input term;
    h0: (nlayers, B_p, H_p) f32; whh0: (H_p, H_p) bf16;
    wcat: (nlayers-1, 2*H_p, H_p) bf16; bcat: (nlayers-1, 1, H_p) f32."""
    seq_len, B_p, H_p = z0.shape
    nlayers = h0.shape[0]

    inputs = [z0, h0, whh0]
    in_specs = [
        pl.BlockSpec((1, B_p, H_p), lambda t: (t, 0, 0)),
        pl.BlockSpec((nlayers, B_p, H_p), lambda t: (0, 0, 0)),
        pl.BlockSpec((H_p, H_p), lambda t: (0, 0)),
    ]
    if nlayers >= 2:
        inputs += [wcat, bcat]
        in_specs += [
            pl.BlockSpec(wcat.shape, lambda t: (0, 0, 0)),
            pl.BlockSpec(bcat.shape, lambda t: (0, 0, 0)),
        ]

    out_shapes = (
        jax.ShapeDtypeStruct((seq_len, B_p, H_p), jnp.float32),
        jax.ShapeDtypeStruct((nlayers, B_p, H_p), jnp.float32),
    )
    out_specs = (
        pl.BlockSpec((1, B_p, H_p), lambda t: (t, 0, 0)),
        pl.BlockSpec((nlayers, B_p, H_p), lambda t: (0, 0, 0)),
    )

    return pl.pallas_call(
        _make_rnn_kernel(nlayers),
        out_shape=out_shapes,
        grid_spec=pltpu.PrefetchScalarGridSpec(
            num_scalar_prefetch=0,
            grid=(seq_len,),
            in_specs=in_specs,
            out_specs=out_specs,
            scratch_shapes=[pltpu.VMEM((nlayers, B_p, H_p), jnp.float32)],
        ),
        compiler_params=pltpu.CompilerParams(
            dimension_semantics=("arbitrary",),   # serial recurrence over time
            vmem_limit_bytes=VMEM_LIMIT,
        ),
    )(*inputs)


# ----------------------------------------------------------------------------
# Pallas kernel: decoder (Linear) fused with log_softmax, tiled over rows.
# Padded vocab columns carry bias = -1e30 so they vanish from the softmax.
# ----------------------------------------------------------------------------
def _decoder_kernel(x_ref, w_ref, b_ref, o_ref):
    logits = (
        jnp.dot(x_ref[...], w_ref[...], preferred_element_type=jnp.float32)
        + b_ref[...]
    )
    m = jnp.max(logits, axis=-1, keepdims=True)
    s = logits - m
    lse = jnp.log(jnp.sum(jnp.exp(s), axis=-1, keepdims=True))
    o_ref[...] = s - lse


def decoder_logsoftmax(x, w, b, *, tm=256):
    """x: (M, H_p) bf16, w: (H_p, N_p) bf16, b: (1, N_p) f32 -> (M, N_p) f32."""
    M, K = x.shape
    N = w.shape[1]
    tm_eff = min(tm, _round_up(M, 16))
    Mp = _round_up(M, tm_eff)
    if Mp != M:
        x = jnp.pad(x, ((0, Mp - M), (0, 0)))
    out = pl.pallas_call(
        _decoder_kernel,
        out_shape=jax.ShapeDtypeStruct((Mp, N), jnp.float32),
        grid_spec=pltpu.PrefetchScalarGridSpec(
            num_scalar_prefetch=0,
            grid=(Mp // tm_eff,),
            in_specs=[
                pl.BlockSpec((tm_eff, K), lambda i: (i, 0)),
                pl.BlockSpec((K, N), lambda i: (0, 0)),
                pl.BlockSpec((1, N), lambda i: (0, 0)),
            ],
            out_specs=pl.BlockSpec((tm_eff, N), lambda i: (i, 0)),
        ),
        compiler_params=pltpu.CompilerParams(
            dimension_semantics=("parallel",),
            vmem_limit_bytes=VMEM_LIMIT,
        ),
    )(x, w, b)
    return out[:M] if Mp != M else out


# ----------------------------------------------------------------------------
# Parameter init (PyTorch-layout) and one-time prep (transpose/pad/cast)
# ----------------------------------------------------------------------------
CONV_SHAPES = [(24, 3, 5, 5), (36, 24, 5, 5), (48, 36, 5, 5), (64, 48, 3, 3), (64, 64, 3, 3)]
CONV_STRIDES = [2, 2, 2, 1, 1]


def init_params(key, ntoken, nhid, nlayers, ninp):
    params = {"convs": [], "rnn": []}
    for shp in CONV_SHAPES:
        key, k1, k2 = jax.random.split(key, 3)
        bound = 1.0 / math.sqrt(shp[1] * shp[2] * shp[3])
        w = jax.random.uniform(k1, shp, jnp.float32, -bound, bound)
        b = jax.random.uniform(k2, (shp[0],), jnp.float32, -bound, bound)
        params["convs"].append((w, b))
    for l in range(nlayers):
        in_f = ninp if l == 0 else nhid
        bound = 1.0 / math.sqrt(nhid)
        key, k1, k2, k3, k4 = jax.random.split(key, 5)
        w_ih = jax.random.uniform(k1, (nhid, in_f), jnp.float32, -bound, bound)
        w_hh = jax.random.uniform(k2, (nhid, nhid), jnp.float32, -bound, bound)
        b_ih = jax.random.uniform(k3, (nhid,), jnp.float32, -bound, bound)
        b_hh = jax.random.uniform(k4, (nhid,), jnp.float32, -bound, bound)
        params["rnn"].append((w_ih, w_hh, b_ih, b_hh))
    key, k1 = jax.random.split(key)
    params["dec_w"] = jax.random.uniform(k1, (ntoken, nhid), jnp.float32, -0.1, 0.1)
    params["dec_b"] = jnp.zeros((ntoken,), jnp.float32)  # nn.init.zeros_
    return params


def prepare_params(params, ntoken, nhid, nlayers):
    """Done ONCE: pre-transpose, pad to lane/sublane-friendly shapes, cast MXU operands to bf16."""
    H_p = _round_up(nhid, 128)
    N_p = _round_up(ntoken, 128)
    prep = {"ntoken": ntoken, "nhid": nhid, "nlayers": nlayers, "H_p": H_p, "N_p": N_p}

    convs = []
    for (w, b), stride in zip(params["convs"], CONV_STRIDES):
        cout, cin, kh, kw = w.shape
        cp = _round_up(cout, 128)
        # NHWC im2col order is (kh, kw, cin) -> flatten weight accordingly
        wf = w.transpose(2, 3, 1, 0).reshape(kh * kw * cin, cout)
        wf = jnp.pad(wf, ((0, 0), (0, cp - cout))).astype(jnp.bfloat16)
        bp = jnp.pad(b, (0, cp - cout)).reshape(1, cp).astype(jnp.float32)
        convs.append((wf, bp, stride, kh, kw, cout))
    prep["convs"] = convs

    # RNN layer 0: input projection hoisted out of the recurrence; b_hh folded into its bias.
    w_ih0, w_hh0, b_ih0, b_hh0 = params["rnn"][0]
    prep["w_in0"] = jnp.pad(w_ih0.T, ((0, 0), (0, H_p - nhid))).astype(jnp.bfloat16)   # (ninp, H_p)
    prep["b0"] = jnp.pad(b_ih0 + b_hh0, (0, H_p - nhid)).reshape(1, H_p)
    prep["whh0"] = jnp.pad(w_hh0.T, ((0, H_p - nhid), (0, H_p - nhid))).astype(jnp.bfloat16)

    # RNN layers >= 1: stacked [W_ih; W_hh] and pre-summed bias, all layers in one resident array.
    if nlayers >= 2:
        wcat, bcat = [], []
        for l in range(1, nlayers):
            w_ih, w_hh, b_ih, b_hh = params["rnn"][l]
            wl = jnp.concatenate([
                jnp.pad(w_ih.T, ((0, H_p - nhid), (0, H_p - nhid))),
                jnp.pad(w_hh.T, ((0, H_p - nhid), (0, H_p - nhid))),
            ], axis=0)                                    # (2*H_p, H_p)
            wcat.append(wl)
            bcat.append(jnp.pad(b_ih + b_hh, (0, H_p - nhid)).reshape(1, H_p))
        prep["wcat"] = jnp.stack(wcat).astype(jnp.bfloat16)   # (L-1, 2*H_p, H_p)
        prep["bcat"] = jnp.stack(bcat)                        # (L-1, 1, H_p) f32

    # decoder: padded vocab columns get bias -1e30 so they drop out of log_softmax
    prep["dec_w"] = jnp.pad(params["dec_w"].T,
                            ((0, H_p - nhid), (0, N_p - ntoken))).astype(jnp.bfloat16)
    prep["dec_b"] = jnp.pad(params["dec_b"], (0, N_p - ntoken),
                            constant_values=-1e30).reshape(1, N_p)
    return prep


# ----------------------------------------------------------------------------
# Full forward pass (equivalent of RNNModel.forward in eval mode)
# ----------------------------------------------------------------------------
def rnn_model_forward(x, hidden, prep):
    seq_len, batch = x.shape[0], x.shape[1]
    nlayers, _, nhid = hidden.shape
    ntoken, H_p, N_p = prep["ntoken"], prep["H_p"], prep["N_p"]
    B_p = _round_up(batch, 8)

    # encoder: 5 convs (no nonlinearity, matching the PyTorch nn.Sequential), NHWC internally
    feat = x.reshape((seq_len * batch,) + x.shape[2:]).transpose(0, 2, 3, 1)  # NCHW -> NHWC
    for (wf, bp, stride, kh, kw, cout) in prep["convs"]:
        feat = conv2d_nhwc(feat, wf, bp, stride, kh, kw, cout)
    # TODO(synk): original module feeds 4-D conv output directly to nn.RNN; we apply the
    # implied flatten in PyTorch's (C, H, W) row-major order.
    feat = feat.transpose(0, 3, 1, 2)                       # back to NCHW for the flatten
    emb = feat.reshape(seq_len, batch, -1)                  # (seq, batch, ninp)
    # dropout == identity at inference

    # hoisted layer-0 input projection over the whole sequence (one big GEMM)
    emb_p = jnp.pad(emb, ((0, 0), (0, B_p - batch), (0, 0)))
    z0 = matmul_bias(emb_p.reshape(seq_len * B_p, -1).astype(jnp.bfloat16),
                     prep["w_in0"], prep["b0"])
    z0 = z0.reshape(seq_len, B_p, H_p)

    # recurrence (serial over time)
    h0 = jnp.pad(hidden, ((0, 0), (0, B_p - batch), (0, H_p - nhid)))
    output, hn = rnn_forward(z0, h0, prep["whh0"], prep.get("wcat"), prep.get("bcat"))

    # decoder + log_softmax (tiled, lane-dense padded vocab)
    logp_pad = decoder_logsoftmax(
        output.reshape(seq_len * B_p, H_p).astype(jnp.bfloat16),
        prep["dec_w"], prep["dec_b"])
    logp = (logp_pad.reshape(seq_len, B_p, N_p)[:, :batch, :ntoken]
            .reshape(seq_len * batch, ntoken))
    hn = hn[:, :batch, :nhid]
    return logp, hn


if __name__ == "__main__":
    seq_len, batch = 4, 2
    ntoken, nhid, nlayers = 16, 32, 2
    H = W = 61  # smallest spatial size for which the conv stack yields 1x1 -> ninp = 64
    ninp = 64

    key = jax.random.PRNGKey(0)
    key, kx = jax.random.split(key)
    x = jax.random.normal(kx, (seq_len, batch, 3, H, W), jnp.float32)
    hidden = jnp.zeros((nlayers, batch, nhid), jnp.float32)  # init_hidden for RNN_TANH

    params = init_params(key, ntoken, nhid, nlayers, ninp)
    prep = prepare_params(params, ntoken, nhid, nlayers)

    logp, hn = rnn_model_forward(x, hidden, prep)
    jax.block_until_ready((logp, hn))
    assert logp.shape == (seq_len * batch, ntoken)
    assert hn.shape == (nlayers, batch, nhid)
    assert bool(jnp.all(jnp.isfinite(logp))) and bool(jnp.all(jnp.isfinite(hn)))
    print("KERNEL_OK")
</pallas_src>

<mosaic_0001>
module attributes {stable_mosaic.version = 11 : i64} {
  func.func @_mm_bias_kernel(%arg0: i32, %arg1: memref<512x75xbf16, #tpu.memory_space<vmem>>, %arg2: memref<75x128xbf16, #tpu.memory_space<vmem>>, %arg3: memref<1x128xf32, #tpu.memory_space<vmem>>, %arg4: memref<512x128xf32, #tpu.memory_space<vmem>>) attributes {dimension_semantics = [#tpu.dimension_semantics<parallel>], iteration_bounds = array<i64: 14>, scalar_prefetch = 0 : i64, scratch_operands = 0 : i64, tpu.core_type = #tpu.core_type<tc>, window_params = [{transform_indices = @transform_0, window_bounds = array<i64: 512, 75>}, {pipeline_mode = #tpu.pipeline_mode<synchronous>, transform_indices = @transform_1, window_bounds = array<i64: 75, 128>}, {pipeline_mode = #tpu.pipeline_mode<synchronous>, transform_indices = @transform_2, window_bounds = array<i64: 1, 128>}, {transform_indices = @transform_3, window_bounds = array<i64: 512, 128>}]} {
    %c0 = arith.constant 0 : index
    %c0_0 = arith.constant 0 : index
    %0 = vector.load %arg1[%c0, %c0_0] : memref<512x75xbf16, #tpu.memory_space<vmem>>, vector<512x75xbf16>
    %c0_1 = arith.constant 0 : index
    %c0_2 = arith.constant 0 : index
    %1 = vector.load %arg2[%c0_1, %c0_2] : memref<75x128xbf16, #tpu.memory_space<vmem>>, vector<75x128xbf16>
    %cst = arith.constant dense<0.000000e+00> : vector<512x128xf32>
    %2 = tpu.matmul %0, %1, %cst {dimension_numbers = #tpu.dot_dimension_numbers<[1], [0], [0], [1], [0, 0, 1, 1], [], []>} : vector<512x75xbf16>, vector<75x128xbf16>, vector<512x128xf32> -> vector<512x128xf32>
    %c0_3 = arith.constant 0 : index
    %c0_4 = arith.constant 0 : index
    %3 = vector.load %arg3[%c0_3, %c0_4] : memref<1x128xf32, #tpu.memory_space<vmem>>, vector<1x128xf32>
    %4 = vector.broadcast %3 : vector<1x128xf32> to vector<512x128xf32>
    %5 = arith.addf %2, %4 : vector<512x128xf32>
    %c0_5 = arith.constant 0 : index
    %c0_6 = arith.constant 0 : index
    %6 = vector.load %arg4[%c0_5, %c0_6] : memref<512x128xf32, #tpu.memory_space<vmem>>, vector<512x128xf32>
    tpu.vector_store %arg4[%c0_5, %c0_6], %5 {strides = array<i32>} : memref<512x128xf32, #tpu.memory_space<vmem>>, vector<512x128xf32>,
    return
  }
  func.func @transform_0(%arg0: i32) -> (i32, i32) {
    %c0_i32 = arith.constant 0 : i32
    %c0_i32_0 = arith.constant 0 : i32
    return %arg0, %c0_i32 : i32, i32
  }
  func.func @transform_1(%arg0: i32) -> (i32, i32) {
    %c0_i32 = arith.constant 0 : i32
    %c0_i32_0 = arith.constant 0 : i32
    %c0_i32_1 = arith.constant 0 : i32
    return %c0_i32, %c0_i32_0 : i32, i32
  }
  func.func @transform_2(%arg0: i32) -> (i32, i32) {
    %c0_i32 = arith.constant 0 : i32
    %c0_i32_0 = arith.constant 0 : i32
    %c0_i32_1 = arith.constant 0 : i32
    return %c0_i32, %c0_i32_0 : i32, i32
  }
  func.func @transform_3(%arg0: i32) -> (i32, i32) {
    %c0_i32 = arith.constant 0 : i32
    %c0_i32_0 = arith.constant 0 : i32
    return %arg0, %c0_i32 : i32, i32
  }
}

</mosaic_0001>

<bundles_post_ra>
// kernel: tpu_custom_call.1
= control target key start
LH: loop header
LB: loop body
LE: loop exit
PB: predicated region body
PF: predicated region fallthrough
CT: control target
= control target key end

     0   :  { %8 = vsyncpa [#allocation3], 0  ;;  %s1670_s0 = inlined_call_operand.vmem [shape: bf16[7168,75], index: 0, kind: input, shape index: {}]   ;;  %s1671_s1 = inlined_call_operand.vmem [shape: bf16[75,128], index: 1, kind: input, shape index: {}]   ;;  %s1672_s2 = inlined_call_operand.vmem [shape: f32[1,128], index: 2, kind: input, shape index: {}]   ;;  %s1673_s3 = inlined_call_operand.hbm [shape: f32[7168,128], index: 3, kind: output, shape index: {}]  }
   0x1   :  { %10 = vsyncpa [#allocation3 + $0x1], 0  ;;  %s1347_s12 = smov 0   ;;  %s1349_s13 = smov 0  }
   0x2   :  { %s1351_s14 = smov 0   ;;  %s1353_s15 = smov 0  }
   0x3 LB: > { %s1368_s16 = sadd.s32 4294967295, %s1321_s15   ;;  %s976_s17 = sadd.s32 4294967294, %s1321_s15   ;;  %s1321_s15 = sphi %s1353_s15, %s1679_s15   ;;  %s1317_s14 = sphi %s1351_s14, %s1678_s14   ;;  %s1313_s13 = sphi %s1349_s13, %s1677_s13   ;;  %s1309_s12 = sphi %s1347_s12, %s1676_s12  }
   0x4   : > { %s1372_s18 = sadd.s32 1, %s1321_s15   ;;  %s91_s19 = sadd.s32 1, %s1317_s14 }
   0x5   : > { %s88_s20 = ssub.s32 %s1321_s15, %s1372_s18  ;;  %p101_p0 = scmp.ne.s32.totalorder %s1317_s14, %s1313_s13 }
   0x6   : > { %p89_p1 = scmp.eq.s32.totalorder %s88_s20, 0  ;;  %p102_p2 = scmp.eq.s32.totalorder %s1368_s16, 13 }
   0x7   : > { %p107_p3 = scmp.ne.s32.totalorder %s1313_s13, %s1309_s12  ;;  %p108_p4 = scmp.eq.s32.totalorder %s976_s17, 13 }
   0x8   : > { %s1383_s21 = scalar_select %p89_p1, %s1317_s14, %s91_s19  }
   0x9   : > { %p1385_p5 = por %p102_p2, %p101_p0  ;;  %p1389_p6 = por %p108_p4, %p107_p3 }
   0xa   : > { %p979_p7 = scmp.ge.s32.totalorder %s1321_s15, 1  ;;  %p141_p8 = scmp.lt.s32.totalorder %s1321_s15, 15 }
   0xc   : > { %p142_p9 = pnand %p979_p7, %p141_p8 }
   0xd   : > { %v1222_v0 = vld [vmem:[%s1671_s1] sm:$0xff] (!%p142_p9)   ;;  %v1223_v1 = vld [vmem:[%s1671_s1 + $0x8] sm:$0xff] (!%p142_p9)   ;;  %vm540_vm0 = vcmask (!%p142_p9), 1044480   ;;  %v1224_v2 = vld [vmem:[%s1671_s1 + $0x10] sm:$0xff] (!%p142_p9)   ;;  %s981_s30 = sshll.u32 (!%p142_p9), %s1368_s16, 6  ;;  %vm541_vm1 = vcmask (!%p142_p9), 1045504  }
   0xe   : > { %145 = sbr.rel (%p142_p9) target bundleno = 322 (0x142), region = 32  ;;  %1096 = vmatprep.subr.bf16.mxu0 (!%p142_p9), %v1222_v0  ;;  %1170 = vmatprep.subr.bf16.mxu1 (!%p142_p9), %v1222_v0  ;;  %v1323_v3 = vmov (!%p142_p9), 65535   ;;  %p166_p10 = scmp.lt.s32.totalorder (!%p142_p9), %s981_s30, 895  ;;  %v1225_v5 = vld [vmem:[%s1671_s1 + $0x18] sm:$0xff] (!%p142_p9)   ;;  %v1226_v6 = vld [vmem:[%s1671_s1 + $0x20] sm:$0x3f] (!%p142_p9)  }
   0xf   : > { %1097 = vmatpush3.bf16.msra.mxu0 (!%p142_p9), %v1222_v0  ;;  %1175 = vmatpush3.bf16.msra.mxu1 (!%p142_p9), %v1222_v0  ;;  %v542_v4 = vsel (!%p142_p9), %vm540_vm0, 4294967295, %v1323_v3  ;;  %vm443_vm2 = vcmask (!%p142_p9), 613376   ;;  %s162_s17 = sand.u32 (!%p142_p9), 1, %s1313_s13   ;;  %v1486_v41 = vld [vmem:[%s1672_s2] ss:$0 sm:$0xff] (!%p142_p9)  ;;  %s1058_s26 = sshll.u32 (!%p142_p9), %s1368_s16, 13 }
  0x10   : > { %1098 = vmatprep.subr.bf16.mxu0 (!%p142_p9), %v1223_v1  ;;  %1171 = vmatprep.subr.bf16.mxu1 (!%p142_p9), %v1223_v1  ;;  %v543_v7 = vsel (!%p142_p9), %vm541_vm1, %v542_v4, 0  ;;  %s980_s19 = sshll.u32 (!%p142_p9), %s162_s17, 9  ;;  %s1615_s29 = scalar_lea.hbm (!%p142_p9), %s1673_s3, %s1058_s26 }
  0x11   : > { %v545_v8 = vand.u32 (!%p142_p9), %v1226_v6, %v543_v7  ;;  %s1492_s25 = scalar_lea.vmem (!%p142_p9), [#allocation2], %s980_s19  ;;  %s1324_s5 = smov (!%p142_p9), [#allocation2]  }
  0x12   : > { %s914_s27 = sshll.u32 (!%p142_p9), %s1492_s25, 4  ;;  %s1263_s6 = sshll.u32 (!%p142_p9), %s1324_s5, 4  ;;  %s1617_s27 = int_to_ptr.vmem [resolvable:$true] %s914_s27  ;;  %s1264_s6 = int_to_ptr.vmem [resolvable:$false] %s1263_s6 }
  0x13   : > { %1099 = vmatpush3.bf16.msra.mxu0 (!%p142_p9), %v1223_v1  ;;  %1176 = vmatpush3.bf16.msra.mxu1 (!%p142_p9), %v1223_v1  ;;  %s1259_s4 = scalar_lea.vmem (!%p142_p9), %s1617_s27, 8192  ;;  %s1265_s7 = scalar_lea.vmem (!%p142_p9), %s1264_s6, 16384 }
  0x14   : > { %1100 = vmatprep.subr.bf16.mxu0 (!%p142_p9), %v1224_v2  ;;  %1172 = vmatprep.subr.bf16.mxu1 (!%p142_p9), %v1224_v2  ;;  %p1260_p11 = scmp.ne.s32.totalorder (!%p142_p9), %s1617_s27, %s1259_s4  ;;  %p1266_p0 = scmp.lt.s32.totalorder (!%p142_p9), %s1617_s27, %s1264_s6 }
  0x15   : > { %s1681_s30 = smov (!%p166_p10, %s981_s30), 895  ;;  %p1267_p1 = scmp.lt.s32.totalorder %s1265_s7, %s1259_s4 }
  0x16   : > { %s982_s8 = sshll.u32 %s1681_s30, 2  ;;  %s1629_s30 = scalar_lea.sflag [#allocation3], %s162_s17 }
  0x17   : > { %1101 = vmatpush3.bf16.msra.mxu0 %v1224_v2  ;;  %1177 = vmatpush3.bf16.msra.mxu1 %v1224_v2  ;;  %s1414_s11 = scalar_lea.vmem %s1670_s0, %s982_s8  ;;  %p1261_p12 = pnand %p1260_p11, %p1385_p5 }
  0x18   : > { %1102 = vmatprep.subr.bf16.mxu0 %v1225_v5  ;;  %1173 = vmatprep.subr.bf16.mxu1 %v1225_v5  ;;  %v1227_v9 = vld [vmem:[%s1414_s11] sm:$0xff]   ;;  %v1229_v11 = vld [vmem:[%s1414_s11 + $0x8] sm:$0xff]   ;;  %v1231_v13 = vld [vmem:[%s1414_s11 + $0x10] sm:$0xff]   ;;  %p1268_p2 = por %p1267_p1, %p1266_p0 }
  0x19   : > { %v1228_v10 = vld [vmem:[%s1414_s11 + $0x80] sm:$0xff]   ;;  %1106 = vmatprep.mubr.msk.bf16.mxu0 %vm443_vm2, %v1227_v9  ;;  %v1230_v12 = vld [vmem:[%s1414_s11 + $0x88] sm:$0xff]   ;;  %v1232_v14 = vld [vmem:[%s1414_s11 + $0x90] sm:$0xff]   ;;  %p1262_p13 = pneg %p1261_p12 }
  0x1a   : > { %1138 = vmatprep.mubr.msk.bf16.mxu1 %vm443_vm2, %v1228_v10  ;;  %v1233_v15 = vld [vmem:[%s1414_s11 + $0x18] sm:$0xff]   ;;  %v1235_v17 = vld [vmem:[%s1414_s11 + $0x20] sm:$0xff]   ;;  %v1237_v19 = vld [vmem:[%s1414_s11 + $0x28] sm:$0xff]  }
  0x1b   : > { %1103 = vmatpush3.bf16.msra.mxu0 %v1225_v5  ;;  %1178 = vmatpush3.bf16.msra.mxu1 %v1225_v5  ;;  %v1234_v16 = vld [vmem:[%s1414_s11 + $0x98] sm:$0xff]   ;;  %v1236_v18 = vld [vmem:[%s1414_s11 + $0xa0] sm:$0xff]   ;;  %v1238_v20 = vld [vmem:[%s1414_s11 + $0xa8] sm:$0xff]   ;;  %p1269_p3 = pnand %p1268_p2, %p1262_p13 }
  0x1c   : > { %1104 = vmatprep.subr.bf16.mxu0 %v545_v8  ;;  %1174 = vmatprep.subr.bf16.mxu1 %v545_v8  ;;  %v1239_v21 = vld [vmem:[%s1414_s11 + $0x30] sm:$0xff]   ;;  %v1241_v23 = vld [vmem:[%s1414_s11 + $0x38] sm:$0xff]   ;;  %v1243_v25 = vld [vmem:[%s1414_s11 + $0x40] sm:$0xff]  }
  0x1d   : > { %v1240_v22 = vld [vmem:[%s1414_s11 + $0xb0] sm:$0xff]   ;;  %v1242_v24 = vld [vmem:[%s1414_s11 + $0xb8] sm:$0xff]   ;;  %v1244_v26 = vld [vmem:[%s1414_s11 + $0xc0] sm:$0xff]  }
  0x1e   : > { %v1245_v27 = vld [vmem:[%s1414_s11 + $0x48] sm:$0xff]   ;;  %v1247_v29 = vld [vmem:[%s1414_s11 + $0x50] sm:$0xff]   ;;  %v1249_v31 = vld [vmem:[%s1414_s11 + $0x58] sm:$0xff]  }
  0x1f   : > { %1105 = vmatpush3.bf16.msra.mxu0 %v545_v8  ;;  %1179 = vmatpush3.bf16.msra.mxu1 %v545_v8  ;;  %v1246_v28 = vld [vmem:[%s1414_s11 + $0xc8] sm:$0xff]   ;;  %v1248_v30 = vld [vmem:[%s1414_s11 + $0xd0] sm:$0xff]   ;;  %v1250_v32 = vld [vmem:[%s1414_s11 + $0xd8] sm:$0xff]  }
  0x20   : > { %v1251_v33 = vld [vmem:[%s1414_s11 + $0x60] sm:$0xff]   ;;  %v1253_v35 = vld [vmem:[%s1414_s11 + $0x68] sm:$0xff]   ;;  %v1255_v37 = vld [vmem:[%s1414_s11 + $0x70] sm:$0xff]  }
  0x21   : > { %v1252_v34 = vld [vmem:[%s1414_s11 + $0xe0] sm:$0xff]   ;;  %v1254_v36 = vld [vmem:[%s1414_s11 + $0xe8] sm:$0xff]   ;;  %v1256_v38 = vld [vmem:[%s1414_s11 + $0xf0] sm:$0xff]  }
  0x22   : > { %1107 = vmatmul.mubr.msk.bf16.vlgmr.msra.gmra.mrb[0].mxu0 %vm443_vm2, %v1229_v11  ;;  %1139 = vmatmul.mubr.msk.bf16.vlgmr.msra.gmra.mrb[0].mxu1 %vm443_vm2, %v1230_v12  ;;  %v1257_v39 = vld [vmem:[%s1414_s11 + $0x78] sm:$0xff]  }
  0x23   : > { %1110 = vmatprep.mubr.msk.bf16.mxu0 %vm443_vm2, %v1231_v13  ;;  %1142 = vmatprep.mubr.msk.bf16.mxu1 %vm443_vm2, %v1232_v14  ;;  %v1258_v40 = vld [vmem:[%s1414_s11 + $0xf8] sm:$0xff]  }
  0x2a   : > { %1111 = vmatmul.mubr.msk.bf16.gmra.mrb[4].mxu0 %vm443_vm2, %v1233_v15  ;;  %1143 = vmatmul.mubr.msk.bf16.gmra.mrb[4].mxu1 %vm443_vm2, %v1234_v16 }
  0x2b   : > { %1114 = vmatprep.mubr.msk.bf16.mxu0 %vm443_vm2, %v1235_v17  ;;  %1146 = vmatprep.mubr.msk.bf16.mxu1 %vm443_vm2, %v1236_v18 }
  0x32   : > { %1115 = vmatmul.mubr.msk.bf16.gmra.mrb[8].mxu0 %vm443_vm2, %v1237_v19  ;;  %1147 = vmatmul.mubr.msk.bf16.gmra.mrb[8].mxu1 %vm443_vm2, %v1238_v20 }
  0x33   : > { %1118 = vmatprep.mubr.msk.bf16.mxu0 %vm443_vm2, %v1239_v21  ;;  %1150 = vmatprep.mubr.msk.bf16.mxu1 %vm443_vm2, %v1240_v22 }
  0x3a   : > { %1119 = vmatmul.mubr.msk.bf16.gmra.mrb[12].mxu0 %vm443_vm2, %v1241_v23  ;;  %1151 = vmatmul.mubr.msk.bf16.gmra.mrb[12].mxu1 %vm443_vm2, %v1242_v24 }
  0x3b   : > { %1122 = vmatprep.mubr.msk.bf16.mxu0 %vm443_vm2, %v1243_v25  ;;  %1154 = vmatprep.mubr.msk.bf16.mxu1 %vm443_vm2, %v1244_v26 }
  0x42   : > { %1123 = vmatmul.mubr.msk.bf16.gmra.mrb[16].mxu0 %vm443_vm2, %v1245_v27  ;;  %1155 = vmatmul.mubr.msk.bf16.gmra.mrb[16].mxu1 %vm443_vm2, %v1246_v28 }
  0x43   : > { %1126 = vmatprep.mubr.msk.bf16.mxu0 %vm443_vm2, %v1247_v29  ;;  %1158 = vmatprep.mubr.msk.bf16.mxu1 %vm443_vm2, %v1248_v30 }
  0x4a   : > { %1127 = vmatmul.mubr.msk.bf16.gmra.mrb[20].mxu0 %vm443_vm2, %v1249_v31  ;;  %1159 = vmatmul.mubr.msk.bf16.gmra.mrb[20].mxu1 %vm443_vm2, %v1250_v32 }
  0x4b   : > { %1130 = vmatprep.mubr.msk.bf16.mxu0 %vm443_vm2, %v1251_v33  ;;  %1162 = vmatprep.mubr.msk.bf16.mxu1 %vm443_vm2, %v1252_v34 }
  0x52   : > { %1131 = vmatmul.mubr.msk.bf16.gmra.mrb[24].mxu0 %vm443_vm2, %v1253_v35  ;;  %1163 = vmatmul.mubr.msk.bf16.gmra.mrb[24].mxu1 %vm443_vm2, %v1254_v36 }
  0x53   : > { %1134 = vmatprep.mubr.msk.bf16.mxu0 %vm443_vm2, %v1255_v37  ;;  %1166 = vmatprep.mubr.msk.bf16.mxu1 %vm443_vm2, %v1256_v38 }
  0x5a   : > { %1135 = vmatmul.mubr.msk.bf16.gmra.mrb[28].mxu0 %vm443_vm2, %v1257_v39  ;;  %1167 = vmatmul.mubr.msk.bf16.gmra.mrb[28].mxu1 %vm443_vm2, %v1258_v40 }
  0xf5   : > { %v1108_v42 = vpop.f32.mrb[0].mxu0  ;;  %v1140_v43 = vpop.f32.mrb[0].mxu1 }
  0xf6   : > { %v590_v44 = vadd.f32 %v1108_v42, %v1486_v41  ;;  %v718_v45 = vadd.f32 %v1140_v43, %v1486_v41  ;;  %v581_v46 = vpop.f32.mrb[1].mxu0  ;;  %v709_v47 = vpop.f32.mrb[1].mxu1 }
  0xf7   : > { %v582_v48 = vadd.f32 %v1486_v41, %v581_v46  ;;  %v710_v49 = vadd.f32 %v1486_v41, %v709_v47  ;;  %v1109_v50 = vpop.f32.mrb[2].mxu0  ;;  %v1141_v51 = vpop.f32.mrb[2].mxu1 }
  0xf8   : > { %838 = vst [vmem:[%s1492_s25 + $0x10] sm:$0xff] %v590_v44  ;;  %870 = vst [vmem:[%s1492_s25 + $0x110] sm:$0xff] %v718_v45  ;;  %v593_v52 = vadd.f32 %v1109_v50, %v1486_v41  ;;  %v721_v53 = vadd.f32 %v1141_v51, %v1486_v41  ;;  %v584_v54 = vpop.f32.mrb[3].mxu0  ;;  %v712_v55 = vpop.f32.mrb[3].mxu1 }
  0xf9   : > { %836 = vst [vmem:[%s1492_s25] sm:$0xff] %v582_v48  ;;  %868 = vst [vmem:[%s1492_s25 + $0x100] sm:$0xff] %v710_v49  ;;  %v585_v56 = vadd.f32 %v1486_v41, %v584_v54  ;;  %v713_v57 = vadd.f32 %v1486_v41, %v712_v55 }
  0xfa   : > { %839 = vst [vmem:[%s1492_s25 + $0x18] sm:$0xff] %v593_v52  ;;  %871 = vst [vmem:[%s1492_s25 + $0x118] sm:$0xff] %v721_v53 }
  0xfb   : > { %837 = vst [vmem:[%s1492_s25 + $0x8] sm:$0xff] %v585_v56  ;;  %869 = vst [vmem:[%s1492_s25 + $0x108] sm:$0xff] %v713_v57 }
  0xfd   : > { %v1112_v58 = vpop.f32.mrb[4].mxu0  ;;  %v1144_v59 = vpop.f32.mrb[4].mxu1 }
  0xfe   : > { %v606_v60 = vadd.f32 %v1112_v58, %v1486_v41  ;;  %v734_v61 = vadd.f32 %v1144_v59, %v1486_v41  ;;  %v597_v62 = vpop.f32.mrb[5].mxu0  ;;  %v725_v63 = vpop.f32.mrb[5].mxu1 }
  0xff   : > { %v598_v0 = vadd.f32 %v1486_v41, %v597_v62  ;;  %v726_v1 = vadd.f32 %v1486_v41, %v725_v63  ;;  %v1113_v2 = vpop.f32.mrb[6].mxu0  ;;  %v1145_v3 = vpop.f32.mrb[6].mxu1 }
 0x100   : > { %842 = vst [vmem:[%s1492_s25 + $0x30] sm:$0xff] %v606_v60  ;;  %874 = vst [vmem:[%s1492_s25 + $0x130] sm:$0xff] %v734_v61  ;;  %v609_v4 = vadd.f32 %v1113_v2, %v1486_v41  ;;  %v737_v5 = vadd.f32 %v1145_v3, %v1486_v41  ;;  %v600_v6 = vpop.f32.mrb[7].mxu0  ;;  %v728_v7 = vpop.f32.mrb[7].mxu1 }
 0x101   : > { %840 = vst [vmem:[%s1492_s25 + $0x20] sm:$0xff] %v598_v0  ;;  %872 = vst [vmem:[%s1492_s25 + $0x120] sm:$0xff] %v726_v1  ;;  %v601_v8 = vadd.f32 %v1486_v41, %v600_v6  ;;  %v729_v9 = vadd.f32 %v1486_v41, %v728_v7 }
 0x102   : > { %843 = vst [vmem:[%s1492_s25 + $0x38] sm:$0xff] %v609_v4  ;;  %875 = vst [vmem:[%s1492_s25 + $0x138] sm:$0xff] %v737_v5 }
 0x103   : > { %841 = vst [vmem:[%s1492_s25 + $0x28] sm:$0xff] %v601_v8  ;;  %873 = vst [vmem:[%s1492_s25 + $0x128] sm:$0xff] %v729_v9 }
 0x105   : > { %v1116_v10 = vpop.f32.mrb[8].mxu0  ;;  %v1148_v11 = vpop.f32.mrb[8].mxu1 }
 0x106   : > { %v622_v12 = vadd.f32 %v1116_v10, %v1486_v41  ;;  %v750_v13 = vadd.f32 %v1148_v11, %v1486_v41  ;;  %v613_v14 = vpop.f32.mrb[9].mxu0  ;;  %v741_v15 = vpop.f32.mrb[9].mxu1 }
 0x107   : > { %v614_v16 = vadd.f32 %v1486_v41, %v613_v14  ;;  %v742_v17 = vadd.f32 %v1486_v41, %v741_v15  ;;  %v1117_v18 = vpop.f32.mrb[10].mxu0  ;;  %v1149_v19 = vpop.f32.mrb[10].mxu1 }
 0x108   : > { %846 = vst [vmem:[%s1492_s25 + $0x50] sm:$0xff] %v622_v12  ;;  %878 = vst [vmem:[%s1492_s25 + $0x150] sm:$0xff] %v750_v13  ;;  %v625_v20 = vadd.f32 %v1117_v18, %v1486_v41  ;;  %v753_v21 = vadd.f32 %v1149_v19, %v1486_v41  ;;  %v616_v22 = vpop.f32.mrb[11].mxu0  ;;  %v744_v23 = vpop.f32.mrb[11].mxu1 }
 0x109   : > { %844 = vst [vmem:[%s1492_s25 + $0x40] sm:$0xff] %v614_v16  ;;  %876 = vst [vmem:[%s1492_s25 + $0x140] sm:$0xff] %v742_v17  ;;  %v617_v24 = vadd.f32 %v1486_v41, %v616_v22  ;;  %v745_v25 = vadd.f32 %v1486_v41, %v744_v23 }
 0x10a   : > { %847 = vst [vmem:[%s1492_s25 + $0x58] sm:$0xff] %v625_v20  ;;  %879 = vst [vmem:[%s1492_s25 + $0x158] sm:$0xff] %v753_v21 }
 0x10b   : > { %845 = vst [vmem:[%s1492_s25 + $0x48] sm:$0xff] %v617_v24  ;;  %877 = vst [vmem:[%s1492_s25 + $0x148] sm:$0xff] %v745_v25 }
 0x10d   : > { %v1120_v26 = vpop.f32.mrb[12].mxu0  ;;  %v1152_v27 = vpop.f32.mrb[12].mxu1 }
 0x10e   : > { %v638_v28 = vadd.f32 %v1120_v26, %v1486_v41  ;;  %v766_v29 = vadd.f32 %v1152_v27, %v1486_v41  ;;  %v629_v30 = vpop.f32.mrb[13].mxu0  ;;  %v757_v31 = vpop.f32.mrb[13].mxu1 }
 0x10f   : > { %v630_v32 = vadd.f32 %v1486_v41, %v629_v30  ;;  %v758_v33 = vadd.f32 %v1486_v41, %v757_v31  ;;  %v1121_v34 = vpop.f32.mrb[14].mxu0  ;;  %v1153_v35 = vpop.f32.mrb[14].mxu1 }
 0x110   : > { %850 = vst [vmem:[%s1492_s25 + $0x70] sm:$0xff] %v638_v28  ;;  %882 = vst [vmem:[%s1492_s25 + $0x170] sm:$0xff] %v766_v29  ;;  %v641_v36 = vadd.f32 %v1121_v34, %v1486_v41  ;;  %v769_v37 = vadd.f32 %v1153_v35, %v1486_v41  ;;  %v632_v38 = vpop.f32.mrb[15].mxu0  ;;  %v760_v39 = vpop.f32.mrb[15].mxu1 }
 0x111   : > { %848 = vst [vmem:[%s1492_s25 + $0x60] sm:$0xff] %v630_v32  ;;  %880 = vst [vmem:[%s1492_s25 + $0x160] sm:$0xff] %v758_v33  ;;  %v633_v40 = vadd.f32 %v1486_v41, %v632_v38  ;;  %v761_v42 = vadd.f32 %v1486_v41, %v760_v39 }
 0x112   : > { %851 = vst [vmem:[%s1492_s25 + $0x78] sm:$0xff] %v641_v36  ;;  %883 = vst [vmem:[%s1492_s25 + $0x178] sm:$0xff] %v769_v37 }
 0x113   : > { %849 = vst [vmem:[%s1492_s25 + $0x68] sm:$0xff] %v633_v40  ;;  %881 = vst [vmem:[%s1492_s25 + $0x168] sm:$0xff] %v761_v42 }
 0x115   : > { %v1124_v43 = vpop.f32.mrb[16].mxu0  ;;  %v1156_v44 = vpop.f32.mrb[16].mxu1 }
 0x116   : > { %v654_v45 = vadd.f32 %v1124_v43, %v1486_v41  ;;  %v782_v46 = vadd.f32 %v1156_v44, %v1486_v41  ;;  %v645_v47 = vpop.f32.mrb[17].mxu0  ;;  %v773_v48 = vpop.f32.mrb[17].mxu1 }
 0x117   : > { %v646_v49 = vadd.f32 %v1486_v41, %v645_v47  ;;  %v774_v50 = vadd.f32 %v1486_v41, %v773_v48  ;;  %v1125_v51 = vpop.f32.mrb[18].mxu0  ;;  %v1157_v52 = vpop.f32.mrb[18].mxu1 }
 0x118   : > { %854 = vst [vmem:[%s1492_s25 + $0x90] sm:$0xff] %v654_v45  ;;  %886 = vst [vmem:[%s1492_s25 + $0x190] sm:$0xff] %v782_v46  ;;  %v657_v53 = vadd.f32 %v1125_v51, %v1486_v41  ;;  %v785_v54 = vadd.f32 %v1157_v52, %v1486_v41  ;;  %v648_v55 = vpop.f32.mrb[19].mxu0  ;;  %v776_v56 = vpop.f32.mrb[19].mxu1 }
 0x119   : > { %852 = vst [vmem:[%s1492_s25 + $0x80] sm:$0xff] %v646_v49  ;;  %884 = vst [vmem:[%s1492_s25 + $0x180] sm:$0xff] %v774_v50  ;;  %v649_v57 = vadd.f32 %v1486_v41, %v648_v55  ;;  %v777_v58 = vadd.f32 %v1486_v41, %v776_v56 }
 0x11a   : > { %855 = vst [vmem:[%s1492_s25 + $0x98] sm:$0xff] %v657_v53  ;;  %887 = vst [vmem:[%s1492_s25 + $0x198] sm:$0xff] %v785_v54 }
 0x11b   : > { %853 = vst [vmem:[%s1492_s25 + $0x88] sm:$0xff] %v649_v57  ;;  %885 = vst [vmem:[%s1492_s25 + $0x188] sm:$0xff] %v777_v58 }
 0x11d   : > { %v1128_v59 = vpop.f32.mrb[20].mxu0  ;;  %v1160_v60 = vpop.f32.mrb[20].mxu1 }
 0x11e   : > { %v670_v61 = vadd.f32 %v1128_v59, %v1486_v41  ;;  %v798_v62 = vadd.f32 %v1160_v60, %v1486_v41  ;;  %v661_v63 = vpop.f32.mrb[21].mxu0  ;;  %v789_v0 = vpop.f32.mrb[21].mxu1 }
 0x11f   : > { %v662_v1 = vadd.f32 %v1486_v41, %v661_v63  ;;  %v790_v2 = vadd.f32 %v1486_v41, %v789_v0  ;;  %v1129_v3 = vpop.f32.mrb[22].mxu0  ;;  %v1161_v4 = vpop.f32.mrb[22].mxu1 }
 0x120   : > { %858 = vst [vmem:[%s1492_s25 + $0xb0] sm:$0xff] %v670_v61  ;;  %890 = vst [vmem:[%s1492_s25 + $0x1b0] sm:$0xff] %v798_v62  ;;  %v673_v5 = vadd.f32 %v1129_v3, %v1486_v41  ;;  %v801_v6 = vadd.f32 %v1161_v4, %v1486_v41  ;;  %v664_v7 = vpop.f32.mrb[23].mxu0  ;;  %v792_v8 = vpop.f32.mrb[23].mxu1 }
 0x121   : > { %856 = vst [vmem:[%s1492_s25 + $0xa0] sm:$0xff] %v662_v1  ;;  %888 = vst [vmem:[%s1492_s25 + $0x1a0] sm:$0xff] %v790_v2  ;;  %v665_v9 = vadd.f32 %v1486_v41, %v664_v7  ;;  %v793_v10 = vadd.f32 %v1486_v41, %v792_v8 }
 0x122   : > { %859 = vst [vmem:[%s1492_s25 + $0xb8] sm:$0xff] %v673_v5  ;;  %891 = vst [vmem:[%s1492_s25 + $0x1b8] sm:$0xff] %v801_v6 }
 0x123   : > { %857 = vst [vmem:[%s1492_s25 + $0xa8] sm:$0xff] %v665_v9  ;;  %889 = vst [vmem:[%s1492_s25 + $0x1a8] sm:$0xff] %v793_v10 }
 0x125   : > { %v1132_v11 = vpop.f32.mrb[24].mxu0  ;;  %v1164_v12 = vpop.f32.mrb[24].mxu1 }
 0x126   : > { %v686_v13 = vadd.f32 %v1132_v11, %v1486_v41  ;;  %v814_v14 = vadd.f32 %v1164_v12, %v1486_v41  ;;  %v677_v15 = vpop.f32.mrb[25].mxu0  ;;  %v805_v16 = vpop.f32.mrb[25].mxu1 }
 0x127   : > { %v678_v17 = vadd.f32 %v1486_v41, %v677_v15  ;;  %v806_v18 = vadd.f32 %v1486_v41, %v805_v16  ;;  %v1133_v19 = vpop.f32.mrb[26].mxu0  ;;  %v1165_v20 = vpop.f32.mrb[26].mxu1 }
 0x128   : > { %862 = vst [vmem:[%s1492_s25 + $0xd0] sm:$0xff] %v686_v13  ;;  %894 = vst [vmem:[%s1492_s25 + $0x1d0] sm:$0xff] %v814_v14  ;;  %v689_v21 = vadd.f32 %v1133_v19, %v1486_v41  ;;  %v817_v22 = vadd.f32 %v1165_v20, %v1486_v41  ;;  %v680_v23 = vpop.f32.mrb[27].mxu0  ;;  %v808_v24 = vpop.f32.mrb[27].mxu1 }
 0x129   : > { %860 = vst [vmem:[%s1492_s25 + $0xc0] sm:$0xff] %v678_v17  ;;  %892 = vst [vmem:[%s1492_s25 + $0x1c0] sm:$0xff] %v806_v18  ;;  %v681_v25 = vadd.f32 %v1486_v41, %v680_v23  ;;  %v809_v26 = vadd.f32 %v1486_v41, %v808_v24 }
 0x12a   : > { %863 = vst [vmem:[%s1492_s25 + $0xd8] sm:$0xff] %v689_v21  ;;  %895 = vst [vmem:[%s1492_s25 + $0x1d8] sm:$0xff] %v817_v22 }
 0x12b   : > { %861 = vst [vmem:[%s1492_s25 + $0xc8] sm:$0xff] %v681_v25  ;;  %893 = vst [vmem:[%s1492_s25 + $0x1c8] sm:$0xff] %v809_v26 }
 0x12d   : > { %v1136_v27 = vpop.f32.mrb[28].mxu0  ;;  %v1168_v28 = vpop.f32.mrb[28].mxu1 }
 0x12e   : > { %v702_v29 = vadd.f32 %v1136_v27, %v1486_v41  ;;  %v830_v30 = vadd.f32 %v1168_v28, %v1486_v41  ;;  %v693_v31 = vpop.f32.mrb[29].mxu0  ;;  %v821_v32 = vpop.f32.mrb[29].mxu1 }
 0x12f   : > { %v694_v33 = vadd.f32 %v1486_v41, %v693_v31  ;;  %v822_v34 = vadd.f32 %v1486_v41, %v821_v32  ;;  %v1137_v35 = vpop.f32.mrb[30].mxu0  ;;  %v1169_v36 = vpop.f32.mrb[30].mxu1 }
 0x130   : > { %866 = vst [vmem:[%s1492_s25 + $0xf0] sm:$0xff] %v702_v29  ;;  %898 = vst [vmem:[%s1492_s25 + $0x1f0] sm:$0xff] %v830_v30  ;;  %v705_v37 = vadd.f32 %v1137_v35, %v1486_v41  ;;  %v833_v38 = vadd.f32 %v1169_v36, %v1486_v41  ;;  %v696_v39 = vpop.f32.mrb[31].mxu0  ;;  %v824_v40 = vpop.f32.mrb[31].mxu1 }
 0x131   : > { %864 = vst [vmem:[%s1492_s25 + $0xe0] sm:$0xff] %v694_v33  ;;  %896 = vst [vmem:[%s1492_s25 + $0x1e0] sm:$0xff] %v822_v34  ;;  %v697_v42 = vadd.f32 %v1486_v41, %v696_v39  ;;  %v825_v43 = vadd.f32 %v1486_v41, %v824_v40 }
 0x132   : > { %867 = vst [vmem:[%s1492_s25 + $0xf8] sm:$0xff] %v705_v37  ;;  %899 = vst [vmem:[%s1492_s25 + $0x1f8] sm:$0xff] %v833_v38 }
 0x133   : > { %865 = vst [vmem:[%s1492_s25 + $0xe8] sm:$0xff] %v697_v42  ;;  %897 = vst [vmem:[%s1492_s25 + $0x1e8] sm:$0xff] %v825_v43 }
 0x134   : > { %1272 = shalt.err (!%p1269_p3)
}
 0x135   : > { %s1273_s8 = scalar_lea.hbm %s1615_s29, 8192  ;;  %s1277_s11 = scalar_lea.hbm %s1673_s3, 114688 }
 0x136   : > { %p1274_p4 = scmp.ne.s32.totalorder %s1615_s29, %s1273_s8  ;;  %p1278_p9 = scmp.lt.u32.totalorder %s1615_s29, %s1673_s3 }
 0x137   : > { %p1279_p10 = scmp.lt.u32.totalorder %s1277_s11, %s1273_s8  ;;  %p1281_p12 = scmp.lt.u32.totalorder %s1273_s8, %s1615_s29 }
 0x138   : > { %p1275_p7 = pnand %p1274_p4, %p1385_p5 }
 0x139   : > { %p1280_p11 = por %p1279_p10, %p1278_p9 }
 0x13a   : > { %p1276_p8 = pneg %p1275_p7 }
 0x13b   : > { %p1282_p13 = por %p1281_p12, %p1280_p11 }
 0x13d   : > { %p1283_p0 = pnand %p1282_p13, %p1276_p8 }
 0x13f   : > { %1286 = shalt.err (!%p1283_p0)
}
 0x140   : > { %s1325_s20 = smov 128   ;;  %s1326_s24 = smov 8  }
 0x141   : > { %1180 = dma.vmem_to_hbm [thread:$0]  (%p1385_p5), %s1617_s27, 8192, %s1615_s29, %s1629_s30, %s1325_s20, %s1325_s20, %s1326_s24  }
 0x142 PF: > { %p1186_p1 = scmp.ge.s32.totalorder %s1321_s15, 2  ;;  %s929_s25 = sand.u32 1, %s1309_s12  }
 0x143   : > { %s930_s26 = scalar_lea.sflag [#allocation3], %s929_s25 }
 0x144   : > { %p1183_p2 = pnand %p1186_p1, %p1389_p6 }
 0x146   : > { %1304 = dma.done.wait (!%p1183_p2), %s930_s26, 8192  }
 0x147   : > { %1306 = vsyncadd (!%p1183_p2), %s930_s26, 4294959104  ;;  %p13_p3 = scmp.ge.s32.totalorder %s1372_s18, 16   ;;  %s1676_s12 = smov %s1313_s13 }
 0x148   : > { %s1677_s13 = smov %s1317_s14  ;;  %s1678_s14 = smov %s1383_s21 }
 0x149   : > { %s1679_s15 = smov %s1372_s18  ;;  %15 = sbr.rel (!%p13_p3) target bundleno = 3 (0x3), region = 67 }
 0x150   :  { %935 = vsyncpa [#allocation3], 1 }
 0x151   :  { %937 = vsyncpa [#allocation3 + $0x1], 1 }

</bundles_post_ra>
